<compile_context>
chip_gen: v6e
topology: v6e:2x2x1
jax: 0.10.0
libtpu: 0.0.40
codegen_flags: <defaults>
</compile_context>

<pallas_src>
import jax
import jax.numpy as jnp
from jax.experimental import pallas as pl
from jax.experimental.pallas import tpu as pltpu


_LANE_CANDIDATES = (4096, 2048, 1024, 512, 256, 128)
_MIN_SPLIT_BYTES = 1 * 1024 * 1024           # force >= 2 grid steps above this
_MAX_SINGLE_BLOCK_BYTES = 16 * 1024 * 1024   # safety cap on one VMEM block


def _round_up(a, m):
    return ((a + m - 1) // m) * m


def _sublane(itemsize):
    # dtype-aware sublane packing: 8 for 32-bit, 16 for 16-bit, 32 for 8-bit
    return {4: 8, 2: 16, 1: 32}.get(itemsize, 8)


def _make_kernel(f):
    def kernel(x_ref, o_ref):
        # The wrapped function f, applied elementwise on the VPU over the tile.
        o_ref[...] = f(x_ref[...]).astype(o_ref.dtype)
    return kernel


def _pick_lanes(total, sublane):
    """Widest 128-multiple lane width that keeps full sublanes, if any."""
    divisors = [c for c in _LANE_CANDIDATES if total % c == 0]
    for c in divisors:                       # widest with FULL sublanes
        if (total // c) % sublane == 0:
            return c
    for c in divisors:                       # widest with at least sublane rows
        if (total // c) >= sublane:
            return c
    return divisors[0] if divisors else None


def _plan_tile_rows(rows, lanes, itemsize, sublane, max_block_bytes, min_steps):
    """Sublane-aligned row tile (or full-extent rows) for a cdiv grid."""
    row_bytes = max(1, lanes * itemsize)
    cap = max(sublane, (max_block_bytes // row_bytes) // sublane * sublane)
    if min_steps > 1:
        # Shrink the tile so there are at least `min_steps` grid steps
        # (keeps both v7x TensorCores busy and overlaps read/write DMA).
        per_step = _round_up(max(1, -(-rows // min_steps)), sublane)
        cap = min(cap, max(sublane, per_step))
    if rows <= sublane:
        return rows                          # full-extent rows: always legal
    if rows <= cap and min_steps <= 1:
        return rows                          # whole slab fits one legal block
    return cap                               # sublane multiple; edge block masked


def _run_2d(x2d, tile_rows, f, donate_input):
    rows, lanes = x2d.shape
    itemsize = x2d.dtype.itemsize
    grid = (pl.cdiv(rows, tile_rows),)
    block_bytes = tile_rows * lanes * itemsize
    # Explicit VMEM budget: 2 input + 2 output pipeline buffers + slack, so we
    # never sit exactly at v5e's 16 MiB scoped default and stay far below
    # v7x's 64 MiB physical VMEM.
    vmem_limit = int(min(48 * 1024 * 1024,
                         max(8 * 1024 * 1024,
                             4 * block_bytes + 4 * 1024 * 1024)))
    return pl.pallas_call(
        _make_kernel(f),
        out_shape=jax.ShapeDtypeStruct(x2d.shape, x2d.dtype),
        grid_spec=pltpu.PrefetchScalarGridSpec(
            num_scalar_prefetch=0,
            grid=grid,
            in_specs=[pl.BlockSpec((tile_rows, lanes), lambda i: (i, 0))],
            out_specs=pl.BlockSpec((tile_rows, lanes), lambda i: (i, 0)),
        ),
        compiler_params=pltpu.CompilerParams(
            dimension_semantics=("parallel",),
            vmem_limit_bytes=vmem_limit),
        input_output_aliases=({0: 0} if donate_input else {}),
    )(x2d)


def functional_layer(x, f=lambda v: jnp.maximum(v, jnp.zeros_like(v)), *,
                     max_block_bytes=4 * 1024 * 1024,
                     xla_fallback_max_bytes=0,
                     donate_input=False):
    """Apply an elementwise f to x (any shape) via a Pallas TPU kernel."""
    total = int(x.size)
    if total == 0 or x.ndim == 0:
        return f(x).astype(x.dtype)
    itemsize = x.dtype.itemsize
    total_bytes = total * itemsize
    # Optional size gate: for KB-scale activations XLA fusing f into the
    # neighbouring op beats a standalone pallas_call (disabled by default so
    # the demo below actually runs the kernel; ~256 KiB is a sane prod value).
    if total_bytes <= xla_fallback_max_bytes:
        return f(x).astype(x.dtype)

    orig_shape = x.shape
    sublane = _sublane(itemsize)
    min_steps = 2 if total_bytes > _MIN_SPLIT_BYTES else 1

    lanes = _pick_lanes(total, sublane)
    if lanes is not None:
        # Fast path: lane-dense (rows, lanes) view -- pure reshape, no copy.
        rows = total // lanes
    else:
        # General/ragged path: full-extent last dim as lanes, tile flattened
        # leading dims with a cdiv grid (Pallas masks the partial edge block).
        lanes = orig_shape[-1]
        rows = total // lanes

    tile_rows = _plan_tile_rows(rows, lanes, itemsize, sublane,
                                max_block_bytes, min_steps)
    if tile_rows * lanes * itemsize > _MAX_SINGLE_BLOCK_BYTES:
        # TODO(synk): masked lane tiling for huge non-128-divisible last dims.
        return f(x).astype(x.dtype)

    out2d = _run_2d(x.reshape(rows, lanes), tile_rows, f, donate_input)
    return out2d.reshape(orig_shape)


if __name__ == "__main__":
    relu = lambda v: jnp.maximum(v, jnp.zeros_like(v))
    key = jax.random.PRNGKey(0)
    k1, k2, k3 = jax.random.split(key, 3)

    # 1) Small CIFAR-style NCHW activation: fast path, sublane-full (8, 256).
    x1 = jax.random.normal(k1, (2, 4, 16, 16), dtype=jnp.float32)
    o1 = jax.block_until_ready(functional_layer(x1, relu))
    assert o1.shape == x1.shape and o1.dtype == x1.dtype
    assert bool(jnp.allclose(o1, jnp.maximum(x1, 0.0))), "mismatch (fast path)"

    # 2) Ragged shape: general path, no padding, single full-extent block.
    x2 = jax.random.normal(k2, (2, 3, 5, 7), dtype=jnp.float32)
    o2 = jax.block_until_ready(functional_layer(x2, relu))
    assert o2.shape == x2.shape and o2.dtype == x2.dtype
    assert bool(jnp.allclose(o2, jnp.maximum(x2, 0.0))), "mismatch (ragged)"

    # 3) 2 MiB slab: fast path with a 2-step "parallel" grid (v7x megacore,
    #    DMA overlap), 1 MiB blocks, explicit vmem_limit_bytes.
    x3 = jax.random.normal(k3, (8, 64, 32, 32), dtype=jnp.float32)
    o3 = jax.block_until_ready(functional_layer(x3, relu))
    assert o3.shape == x3.shape and o3.dtype == x3.dtype
    assert bool(jnp.allclose(o3, jnp.maximum(x3, 0.0))), "mismatch (large)"

    print("KERNEL_OK")
</pallas_src>

<mosaic_0001>
module attributes {stable_mosaic.version = 11 : i64} {
  func.func @kernel(%arg0: i32, %arg1: memref<8x256xf32, #tpu.memory_space<vmem>>, %arg2: memref<8x256xf32, #tpu.memory_space<vmem>>) attributes {dimension_semantics = [#tpu.dimension_semantics<parallel>], iteration_bounds = array<i64: 1>, scalar_prefetch = 0 : i64, scratch_operands = 0 : i64, tpu.core_type = #tpu.core_type<tc>, window_params = [{transform_indices = @transform_0, window_bounds = array<i64: 8, 256>}, {transform_indices = @transform_1, window_bounds = array<i64: 8, 256>}]} {
    %c0 = arith.constant 0 : index
    %c0_0 = arith.constant 0 : index
    %0 = vector.load %arg1[%c0, %c0_0] : memref<8x256xf32, #tpu.memory_space<vmem>>, vector<8x256xf32>
    %cst = arith.constant 0.000000e+00 : f32
    %1 = vector.broadcast %cst : f32 to vector<8x256xf32>
    %2 = arith.maximumf %0, %1 : vector<8x256xf32>
    %c0_1 = arith.constant 0 : index
    %c0_2 = arith.constant 0 : index
    %3 = vector.load %arg2[%c0_1, %c0_2] : memref<8x256xf32, #tpu.memory_space<vmem>>, vector<8x256xf32>
    tpu.vector_store %arg2[%c0_1, %c0_2], %2 {strides = array<i32>} : memref<8x256xf32, #tpu.memory_space<vmem>>, vector<8x256xf32>,
    return
  }
  func.func @transform_0(%arg0: i32) -> (i32, i32) {
    %c0_i32 = arith.constant 0 : i32
    %c0_i32_0 = arith.constant 0 : i32
    return %arg0, %c0_i32 : i32, i32
  }
  func.func @transform_1(%arg0: i32) -> (i32, i32) {
    %c0_i32 = arith.constant 0 : i32
    %c0_i32_0 = arith.constant 0 : i32
    return %arg0, %c0_i32 : i32, i32
  }
}

</mosaic_0001>

<bundles_post_ra>
// kernel: tpu_custom_call.1
= control target key start
LH: loop header
LB: loop body
LE: loop exit
PB: predicated region body
PF: predicated region fallthrough
CT: control target
= control target key end

     0   :  { %6 = vsyncpa [#allocation3], 0  ;;  %s106_s0 = inlined_call_operand.hbm [shape: f32[8,256], index: 0, kind: input, shape index: {}]   ;;  %s107_s1 = inlined_call_operand.hbm [shape: f32[8,256], index: 1, kind: output, shape index: {}]  }
   0x1   :  { %7 = vsyncpa [#allocation4], 0  ;;  %s88_s6 = smov [#allocation2]  }
   0x2   :  { %s14_s7 = sshll.u32 %s88_s6, 4  ;;  %s15_s7 = int_to_ptr.vmem [resolvable:$true] %s14_s7 }
   0x3   :  { %s52_s8 = scalar_lea.vmem %s15_s7, 256  ;;  %p57_p1 = scmp.lt.s32.totalorder %s15_s7, %s15_s7 }
   0x4   :  { %p53_p0 = scmp.ne.s32.totalorder %s15_s7, %s52_s8  ;;  %p58_p2 = scmp.lt.s32.totalorder %s52_s8, %s52_s8 }
   0x6   :  { %p59_p3 = por %p58_p2, %p57_p1 }
   0x8   :  { %p60_p4 = pnand %p59_p3, %p53_p0 }
   0xa   :  { %63 = shalt.err (!%p60_p4)
}
   0xb   :  { %17 = dma.hbm_to_vmem [thread:$0]  %s106_s0, 256, %s15_s7, [#allocation3]  }
   0xc   :  { %84 = dma.done.wait [#allocation3], 256  }
   0xd   :  { %85 = vsyncadd [#allocation3], 4294967040  ;;  %s89_s11 = smov [#allocation5]   ;;  %v21_v0 = vld [vmem:[#allocation2] sm:$0xff]  ;;  %v22_v1 = vld [vmem:[#allocation2 + $0x8] sm:$0xff] }
   0xe   :  { %s33_s12 = sshll.u32 %s89_s11, 4  ;;  %v23_v2 = vmax.f32 %v21_v0, 0.0  ;;  %v24_v3 = vmax.f32 %v22_v1, 0.0  ;;  %s34_s12 = int_to_ptr.vmem [resolvable:$true] %s33_s12 }
   0xf   :  { %s64_s13 = scalar_lea.vmem %s34_s12, 256  ;;  %p69_p6 = scmp.lt.s32.totalorder %s34_s12, %s34_s12 }
  0x10   :  { %25 = vst [vmem:[#allocation5] sm:$0xff] %v23_v2  ;;  %26 = vst [vmem:[#allocation5 + $0x8] sm:$0xff] %v24_v3  ;;  %p65_p5 = scmp.ne.s32.totalorder %s34_s12, %s64_s13  ;;  %p70_p7 = scmp.lt.s32.totalorder %s64_s13, %s64_s13 }
  0x12   :  { %p71_p8 = por %p70_p7, %p69_p6 }
  0x14   :  { %p72_p9 = pnand %p71_p8, %p65_p5 }
  0x16   :  { %75 = shalt.err (!%p72_p9)
}
  0x17   :  { %36 = dma.vmem_to_hbm [thread:$0]  %s34_s12, 256, %s107_s1, [#allocation4]  }
  0x18   :  { %86 = dma.done.wait [#allocation4], 256  }
  0x19   :  { %87 = vsyncadd [#allocation4], 4294967040 }
  0x1a   :  { %40 = vsyncpa [#allocation3], 1 }
  0x1b   :  { %41 = vsyncpa [#allocation4], 1 }

</bundles_post_ra>
